<compile_context>
chip_gen: v7x
topology: tpu7x:2x2x1
jax: 0.10.0
libtpu: 0.0.40
codegen_flags: <defaults>
</compile_context>

<pallas_src>
import math

import jax
import jax.numpy as jnp
from jax.experimental import pallas as pl
from jax.experimental.pallas import tpu as pltpu


def _spectral_pool_kernel(len_ref, x_ref, fwd_ref, inv_ref, o_ref):
    # len_ref: (B,) int32 in SMEM (scalar prefetch)
    # x_ref:   (C, Lpad)            f32  — current batch element
    # fwd_ref: (Lpad, 2*need_pad)   f32  — per-sample forward rDFT basis [cos | -sin],
    #                                      rows t >= L and bins k >= need already zeroed
    # inv_ref: (2*need_pad, output) f32  — constant fused inverse basis [cinv ; sinv]
    # o_ref:   (C, output)          f32
    i = pl.program_id(0)
    L = len_ref[i]
    output_len = o_ref.shape[-1]

    @pl.when(L >= output_len)
    def _fft_branch():
        # rfft (masked/truncated by the precomputed basis) -> keep `need` bins -> irfft.
        spec = jnp.dot(x_ref[...], fwd_ref[...],
                       preferred_element_type=jnp.float32)          # (C, 2*need_pad)
        o_ref[...] = jnp.dot(spec, inv_ref[...],
                             preferred_element_type=jnp.float32)    # (C, output)

    @pl.when(L < output_len)
    def _copy_branch():
        # Zero-padded passthrough of the first L columns.
        xo = x_ref[...][:, :output_len]                              # (C, output)
        j_idx = jax.lax.broadcasted_iota(jnp.int32, xo.shape, 1)
        o_ref[...] = jnp.where(j_idx < L, xo, 0.0)


def _round_up(v, m):
    return ((v + m - 1) // m) * m


def _build_forward_basis(lengths, l_pad, need, need_pad):
    """Per-sample forward rDFT basis, (B, l_pad, 2*need_pad) f32: [cos | -sin].

    Rows t >= length and bins k >= need are zeroed (so the kernel needs no mask).
    Angles use exact int32 range reduction: ang = 2*pi * ((t*k) mod L) / L.
    """
    t = jnp.arange(l_pad, dtype=jnp.int32)[:, None]        # (l_pad, 1)
    k = jnp.arange(need_pad, dtype=jnp.int32)[None, :]     # (1, need_pad)

    def one(L):
        Ls = jnp.maximum(L, 1)
        # ((t mod L) * k) mod L == (t*k) mod L ; exact while (L-1)*(need_pad-1) < 2**31.
        # TODO(synk): for extreme L*need (> 2**31) this needs a wider modmul.
        m = ((t % Ls) * k) % Ls
        ang = (2.0 * math.pi / Ls.astype(jnp.float32)) * m.astype(jnp.float32)
        valid = (t < L) & (k < need)
        cosb = jnp.where(valid, jnp.cos(ang), 0.0)
        nsinb = jnp.where(valid, -jnp.sin(ang), 0.0)
        return jnp.concatenate([cosb, nsinb], axis=1)       # (l_pad, 2*need_pad)

    return jax.vmap(one)(lengths)


class SpectralpoolingPallas:
    """Pallas port of layers/Spectralpooling.py::Spectralpooling (forward pass)."""

    def __init__(self, outputlength, pad_pos='post', norm='backward', trans=False):
        if norm != 'backward':
            raise NotImplementedError("only norm='backward' (the module default) is implemented")
        self.output = outputlength if outputlength % 2 == 0 else outputlength - 1
        self.need = self.output // 2 + 1
        # Pad the kept-bin count so 2*need_pad is a multiple of 128 (lane-aligned intermediate
        # and MXU-native contraction dim); zero bins contribute nothing.
        self.need_pad = _round_up(self.need, 64)
        self.length = None
        self.pad_pos = pad_pos
        self.norm = norm
        self.trans = trans

        # Data-independent fused inverse-rDFT basis (Hermitian reconstruction of length output):
        #   y = re @ cinv + im @ sinv  ==  [re | im] @ [cinv ; sinv]
        ki = jnp.arange(self.need_pad, dtype=jnp.int32)[:, None]
        ji = jnp.arange(self.output, dtype=jnp.int32)[None, :]
        m = (ki * ji) % self.output                                   # exact int32 range reduction
        ang = (2.0 * math.pi / float(self.output)) * m.astype(jnp.float32)
        k_arange = jnp.arange(self.need_pad)
        w = jnp.where((k_arange == 0) | (k_arange == self.output // 2), 1.0, 2.0)
        w = jnp.where(k_arange < self.need, w, 0.0).astype(jnp.float32)[:, None]
        cinv = (w / float(self.output)) * jnp.cos(ang)                # (need_pad, output)
        sinv = -(w / float(self.output)) * jnp.sin(ang)               # (need_pad, output)
        self._inv = jnp.concatenate([cinv, sinv], axis=0)             # (2*need_pad, output)

    def set_length(self, length):
        self.length = jnp.asarray(length, dtype=jnp.int32).reshape(-1)

    def __call__(self, x):
        if self.trans:
            x = jnp.transpose(x, (0, 2, 1))
        x = x.astype(jnp.float32)
        B, C, L = x.shape

        # Clamp lengths to the actual sequence width (matches torch slicing semantics).
        lengths = jnp.minimum(self.length, jnp.int32(L)).astype(jnp.int32)

        # Copy branch statically slices the first `output` columns; also keep Lpad sublane-even.
        l_pad = _round_up(max(L, self.output), 8)
        if l_pad != L:
            x = jnp.pad(x, ((0, 0), (0, 0), (0, l_pad - L)))

        fwd = _build_forward_basis(lengths, l_pad, self.need, self.need_pad)  # (B, l_pad, 2*need_pad)

        out = pl.pallas_call(
            _spectral_pool_kernel,
            out_shape=jax.ShapeDtypeStruct((B, C, self.output), jnp.float32),
            grid_spec=pltpu.PrefetchScalarGridSpec(
                num_scalar_prefetch=1,
                grid=(B,),
                in_specs=[
                    pl.BlockSpec((None, C, l_pad), lambda i, lens: (i, 0, 0)),
                    pl.BlockSpec((None, l_pad, 2 * self.need_pad), lambda i, lens: (i, 0, 0)),
                    # Constant inverse basis: whole array resident in VMEM, no double-buffering.
                    pl.BlockSpec(memory_space=pltpu.MemorySpace.VMEM),
                ],
                out_specs=pl.BlockSpec((None, C, self.output), lambda i, lens: (i, 0, 0)),
            ),
            compiler_params=pltpu.CompilerParams(
                dimension_semantics=("parallel",)),
        )(lengths, x, fwd, self._inv)

        if self.trans:
            out = jnp.transpose(out, (0, 2, 1))
        return out


def _reference(x, lengths, output_len, norm='backward'):
    """Pure-JAX mirror of the PyTorch forward (ground truth for the test)."""
    B, C, _ = x.shape
    need = output_len // 2 + 1
    outs = []
    for i in range(B):
        Li = int(lengths[i])
        cur = x[i, :, :Li]
        if Li < output_len:
            o = jnp.zeros((C, output_len), jnp.float32).at[:, :Li].set(cur)
        else:
            four = jnp.fft.rfft(cur, axis=-1, norm=norm)[:, :need]
            o = jnp.fft.irfft(four, axis=-1, norm=norm).astype(jnp.float32)
        outs.append(o)
    return jnp.stack(outs)


if __name__ == "__main__":
    key = jax.random.PRNGKey(0)
    B, C, L = 2, 8, 48
    outputlength = 32

    x = jax.random.normal(key, (B, C, L), dtype=jnp.float32)
    lengths = jnp.array([40, 20], dtype=jnp.int32)   # one FFT branch, one copy branch

    pool = SpectralpoolingPallas(outputlength, trans=False)
    pool.set_length(lengths)

    y = pool(x)
    y = jax.block_until_ready(y)

    y_ref = _reference(x, lengths, pool.output)
    assert y.shape == (B, C, pool.output), y.shape
    assert jnp.allclose(y, y_ref, atol=2e-3, rtol=1e-3), float(jnp.max(jnp.abs(y - y_ref)))

    print("KERNEL_OK")
</pallas_src>

<mosaic_0001>
module attributes {stable_mosaic.version = 11 : i64} {
  func.func @_spectral_pool_kernel(%arg0: i32, %arg1: memref<2xi32, #tpu.memory_space<smem>>, %arg2: memref<1x8x48xf32, #tpu.memory_space<vmem>>, %arg3: memref<1x48x128xf32, #tpu.memory_space<vmem>>, %arg4: memref<128x32xf32, #tpu.memory_space<vmem>>, %arg5: memref<1x8x32xf32, #tpu.memory_space<vmem>>) attributes {dimension_semantics = [#tpu.dimension_semantics<parallel>], iteration_bounds = array<i64: 2>, scalar_prefetch = 1 : i64, scratch_operands = 0 : i64, tpu.core_type = #tpu.core_type<tc>, window_params = [{transform_indices = @transform_0, window_bounds = array<i64: 1, 8, 48>}, {transform_indices = @transform_1, window_bounds = array<i64: 1, 48, 128>}, {pipeline_mode = #tpu.pipeline_mode<synchronous>, transform_indices = @transform_2, window_bounds = array<i64: 128, 32>}, {transform_indices = @transform_3, window_bounds = array<i64: 1, 8, 32>}]} {
    %0 = arith.index_cast %arg0 : i32 to index
    %1 = memref.load %arg1[%0] : memref<2xi32, #tpu.memory_space<smem>>
    %c32_i32 = arith.constant 32 : i32
    %2 = arith.cmpi sge, %1, %c32_i32 : i32
    %3 = arith.extui %2 : i1 to i32
    %c0_i32 = arith.constant 0 : i32
    %4 = arith.cmpi ne, %3, %c0_i32 : i32
    scf.if %4 {
      %c0 = arith.constant 0 : index
      %c0_2 = arith.constant 0 : index
      %c0_3 = arith.constant 0 : index
      %8 = vector.load %arg2[%c0, %c0_2, %c0_3] : memref<1x8x48xf32, #tpu.memory_space<vmem>>, vector<1x8x48xf32>
      %9 = vector.shape_cast %8 : vector<1x8x48xf32> to vector<8x48xf32>
      %c0_4 = arith.constant 0 : index
      %c0_5 = arith.constant 0 : index
      %c0_6 = arith.constant 0 : index
      %10 = vector.load %arg3[%c0_4, %c0_5, %c0_6] : memref<1x48x128xf32, #tpu.memory_space<vmem>>, vector<1x48x128xf32>
      %11 = vector.shape_cast %10 : vector<1x48x128xf32> to vector<48x128xf32>
      %cst = arith.constant dense<0.000000e+00> : vector<8x128xf32>
      %12 = tpu.matmul %9, %11, %cst {dimension_numbers = #tpu.dot_dimension_numbers<[1], [0], [0], [1], [0, 0, 1, 1], [], []>} : vector<8x48xf32>, vector<48x128xf32>, vector<8x128xf32> -> vector<8x128xf32>
      %c0_7 = arith.constant 0 : index
      %c0_8 = arith.constant 0 : index
      %13 = vector.load %arg4[%c0_7, %c0_8] : memref<128x32xf32, #tpu.memory_space<vmem>>, vector<128x32xf32>
      %cst_9 = arith.constant dense<0.000000e+00> : vector<8x32xf32>
      %14 = tpu.matmul %12, %13, %cst_9 {dimension_numbers = #tpu.dot_dimension_numbers<[1], [0], [0], [1], [0, 0, 1, 1], [], []>} : vector<8x128xf32>, vector<128x32xf32>, vector<8x32xf32> -> vector<8x32xf32>
      %c0_10 = arith.constant 0 : index
      %c0_11 = arith.constant 0 : index
      %c0_12 = arith.constant 0 : index
      %15 = vector.load %arg5[%c0_10, %c0_11, %c0_12] : memref<1x8x32xf32, #tpu.memory_space<vmem>>, vector<1x8x32xf32>
      %16 = vector.shape_cast %15 : vector<1x8x32xf32> to vector<8x32xf32>
      %17 = vector.shape_cast %14 : vector<8x32xf32> to vector<1x8x32xf32>
      tpu.vector_store %arg5[%c0_10, %c0_11, %c0_12], %17 {strides = array<i32>} : memref<1x8x32xf32, #tpu.memory_space<vmem>>, vector<1x8x32xf32>,
    } else {
    }
    %c32_i32_0 = arith.constant 32 : i32
    %5 = arith.cmpi slt, %1, %c32_i32_0 : i32
    %6 = arith.extui %5 : i1 to i32
    %c0_i32_1 = arith.constant 0 : i32
    %7 = arith.cmpi ne, %6, %c0_i32_1 : i32
    scf.if %7 {
      %c0 = arith.constant 0 : index
      %c0_2 = arith.constant 0 : index
      %c0_3 = arith.constant 0 : index
      %8 = vector.load %arg2[%c0, %c0_2, %c0_3] : memref<1x8x48xf32, #tpu.memory_space<vmem>>, vector<1x8x48xf32>
      %9 = vector.shape_cast %8 : vector<1x8x48xf32> to vector<8x48xf32>
      %10 = vector.extract_strided_slice %9 {offsets = [0, 0], sizes = [8, 32], strides = [1, 1]} : vector<8x48xf32> to vector<8x32xf32>
      %11 = tpu.iota {dimensions = array<i32: 1>} : vector<8x32xi32>
      %12 = vector.broadcast %1 : i32 to vector<8x32xi32>
      %13 = arith.cmpi slt, %11, %12 : vector<8x32xi32>
      %cst = arith.constant 0.000000e+00 : f32
      %14 = vector.broadcast %cst : f32 to vector<8x32xf32>
      %15 = arith.select %13, %10, %14 : vector<8x32xi1>, vector<8x32xf32>
      %c0_4 = arith.constant 0 : index
      %c0_5 = arith.constant 0 : index
      %c0_6 = arith.constant 0 : index
      %16 = vector.load %arg5[%c0_4, %c0_5, %c0_6] : memref<1x8x32xf32, #tpu.memory_space<vmem>>, vector<1x8x32xf32>
      %17 = vector.shape_cast %16 : vector<1x8x32xf32> to vector<8x32xf32>
      %18 = vector.shape_cast %15 : vector<8x32xf32> to vector<1x8x32xf32>
      tpu.vector_store %arg5[%c0_4, %c0_5, %c0_6], %18 {strides = array<i32>} : memref<1x8x32xf32, #tpu.memory_space<vmem>>, vector<1x8x32xf32>,
    } else {
    }
    return
  }
  func.func @transform_0(%arg0: i32, %arg1: memref<2xi32, #tpu.memory_space<smem>>) -> (i32, i32, i32) {
    %c0_i32 = arith.constant 0 : i32
    %c0_i32_0 = arith.constant 0 : i32
    %c0_i32_1 = arith.constant 0 : i32
    return %arg0, %c0_i32, %c0_i32_0 : i32, i32, i32
  }
  func.func @transform_1(%arg0: i32, %arg1: memref<2xi32, #tpu.memory_space<smem>>) -> (i32, i32, i32) {
    %c0_i32 = arith.constant 0 : i32
    %c0_i32_0 = arith.constant 0 : i32
    %c0_i32_1 = arith.constant 0 : i32
    return %arg0, %c0_i32, %c0_i32_0 : i32, i32, i32
  }
  func.func @transform_2(%arg0: i32, %arg1: memref<2xi32, #tpu.memory_space<smem>>) -> (i32, i32) {
    %c0_i32 = arith.constant 0 : i32
    %c0_i32_0 = arith.constant 0 : i32
    %c0_i32_1 = arith.constant 0 : i32
    return %c0_i32, %c0_i32_0 : i32, i32
  }
  func.func @transform_3(%arg0: i32, %arg1: memref<2xi32, #tpu.memory_space<smem>>) -> (i32, i32, i32) {
    %c0_i32 = arith.constant 0 : i32
    %c0_i32_0 = arith.constant 0 : i32
    %c0_i32_1 = arith.constant 0 : i32
    return %arg0, %c0_i32, %c0_i32_0 : i32, i32, i32
  }
}

</mosaic_0001>

<bundles_post_ra>
// kernel: tpu_custom_call.1
= control target key start
LH: loop header
LB: loop body
LE: loop exit
PB: predicated region body
PF: predicated region fallthrough
CT: control target
= control target key end

     0   :  { %s904_s0 = inlined_call_operand.vmem [shape: s32[2], index: 0, kind: input, shape index: {}]   ;;  %s905_s1 = inlined_call_operand.vmem [shape: f32[2,8,48], index: 1, kind: input, shape index: {}]   ;;  %s906_s2 = inlined_call_operand.vmem [shape: f32[2,48,128], index: 2, kind: input, shape index: {}]   ;;  %s907_s3 = inlined_call_operand.vmem [shape: f32[128,32], index: 3, kind: input, shape index: {}]   ;;  %s908_s4 = inlined_call_operand.hbm [shape: f32[2,8,32], index: 4, kind: output, shape index: {}]  }
   0x1   :  { %s9_s17 = sshll.u32 %s904_s0, 4  ;;  %s10_s17 = int_to_ptr.vmem [resolvable:$true] %s9_s17 }
   0x2   :  { %s629_s18 = scalar_lea.vmem %s10_s17, 16  ;;  %p634_p1 = scmp.lt.s32.totalorder %s10_s17, %s10_s17 }
   0x3   :  { %p630_p0 = scmp.ne.s32.totalorder %s10_s17, %s629_s18  ;;  %p635_p2 = scmp.lt.s32.totalorder %s629_s18, %s629_s18 }
   0x5   :  { %p636_p3 = por %p635_p2, %p634_p1 }
   0x7   :  { %p637_p4 = pnand %p636_p3, %p630_p0 }
   0x9   :  { %640 = shalt.err (!%p637_p4)  }
   0xa   :  { %s707_s19 = smov [#allocation3]  }
   0xb   :  { %12 = dma.vmem_to_smem %s10_s17, 16, %s707_s19, [#allocation2] }
   0xc   :  { %685 = dma.done.wait [#allocation2], 16 }
   0xd   :  { %686 = vsyncadd [#allocation2], 4294967280 }
   0xe   :  { %14 = sfence }
   0xf   :  { %15 = vsyncpa [#allocation5], 0 }
  0x10   :  { %17 = vsyncpa [#allocation5 + $0x1], 0  ;;  %s740_s20 = smov 0   ;;  %s742_s21 = smov 0  }
  0x11   :  { %s744_s0 = smov 0   ;;  %s746_s22 = smov 0  }
  0x12 LB: > { %s761_s23 = sadd.s32 4294967295, %s705_s22   ;;  %s464_s24 = sadd.s32 4294967294, %s705_s22   ;;  %s705_s22 = sphi %s746_s22, %s914_s22   ;;  %s701_s0 = sphi %s744_s0, %s913_s0   ;;  %s697_s21 = sphi %s742_s21, %s912_s21   ;;  %s693_s20 = sphi %s740_s20, %s911_s20  }
  0x13   : > { %s765_s25 = sadd.s32 1, %s705_s22   ;;  %s103_s26 = sadd.s32 1, %s701_s0 }
  0x14   : > { %s100_s27 = ssub.s32 %s705_s22, %s765_s25  ;;  %p113_p5 = scmp.ne.s32.totalorder %s701_s0, %s697_s21 }
  0x15   : > { %p101_p6 = scmp.eq.s32.totalorder %s100_s27, 0  ;;  %p114_p7 = scmp.eq.s32.totalorder %s761_s23, 1 }
  0x16   : > { %p119_p8 = scmp.ne.s32.totalorder %s697_s21, %s693_s20  ;;  %p120_p9 = scmp.eq.s32.totalorder %s464_s24, 1 }
  0x17   : > { %s776_s28 = scalar_select %p101_p6, %s701_s0, %s103_s26  }
  0x18   : > { %p778_p10 = por %p114_p7, %p113_p5  ;;  %p782_p11 = por %p120_p9, %p119_p8 }
  0x19   : > { %p467_p12 = scmp.ge.s32.totalorder %s705_s22, 1  ;;  %p156_p13 = scmp.lt.s32.totalorder %s705_s22, 3 }
  0x1b   : > { %p157_p0 = pnand %p467_p12, %p156_p13 }
  0x1c   : > { %s181_s5 = sand.u32 (!%p157_p0), 1, %s697_s21   ;;  %p184_p1 = scmp.lt.s32.totalorder (!%p157_p0), %s761_s23, 1 }
  0x1d   : > { %160 = sbr.rel (%p157_p0) target bundleno = 513 (0x201), region = 32  ;;  %s468_s6 = sshll.u32 (!%p157_p0), %s181_s5, 3 }
  0x1e   : > { %s793_s7 = sld [smem:[#allocation3 + %s761_s23]] (!%p157_p0)  ;;  %s804_s17 = scalar_lea.vmem (!%p157_p0), [#allocation4], %s468_s6 }
  0x24   : > { %s185_s8 = scalar_select %p184_p1, %s761_s23, 1 }
  0x25   : > { %p471_p2 = scmp.lt.s32.totalorder %s793_s7, 32 }
  0x26   : > { %s469_s9 = sshll.u32 %s185_s8, 3  ;;  %s585_s10 = smul.u32 48, %s185_s8  ;;  %v708_v3 = vmov (!%p471_p2), 0.0|0.0   ;;  %vm709_vm0 = vmmov (!%p471_p2), 0   ;;  %v710_v6 = vmov (!%p471_p2), 0.0   ;;  %v279_v7 = vld [vmem:[%s907_s3] sm:$0xff] (!%p471_p2) }
  0x27   : > { %s799_s13 = scalar_lea.vmem %s905_s1, %s469_s9  ;;  %197 = sbr.rel (%p471_p2) target bundleno = 480 (0x1e0), region = 36  ;;  %552 = vmatprep.subr.bf16.mxu0 (!%p471_p2), %v708_v3  ;;  %514 = vmatprep.mubr.msk.f32.mxu0 (!%p471_p2), %vm709_vm0, %v710_v6  ;;  %v280_v8 = vld [vmem:[%s907_s3 + $0x8] sm:$0xff] (!%p471_p2)  ;;  %v281_v11 = vld [vmem:[%s907_s3 + $0x10] sm:$0xff] (!%p471_p2)  ;;  %v282_v12 = vld [vmem:[%s907_s3 + $0x18] sm:$0xff] (!%p471_p2)  ;;  %vm205_vm1 = vcmask (!%p471_p2), 392192   ;;  %vm365_vm2 = vcmask (!%p471_p2), 261120  }
  0x28   : > { %s192_s16 = scalar_lea.vmem %s906_s2, %s585_s10  ;;  %561 = vmatprep.subr.bf16.mxu1 (!%p471_p2), %v708_v3  ;;  %549 = vmatprep.mubr.msk.f32.mxu1 (!%p471_p2), %vm709_vm0, %v710_v6  ;;  %v562_v10 = vpack.c.bf16 (!%p471_p2), %v280_v8, %v279_v7  ;;  %v565_v15 = vpack.c.bf16 (!%p471_p2), %v282_v12, %v281_v11  ;;  %v283_v16 = vld [vmem:[%s907_s3 + $0x20] sm:$0xff] (!%p471_p2)  ;;  %v284_v17 = vld [vmem:[%s907_s3 + $0x28] sm:$0xff] (!%p471_p2)  ;;  %v285_v20 = vld [vmem:[%s907_s3 + $0x30] sm:$0xff] (!%p471_p2) }
  0x29   : > { %v199_v0 = vld [vmem:[%s192_s16] sm:$0xff] (!%p471_p2)  ;;  %v200_v1 = vld [vmem:[%s192_s16 + $0x8] sm:$0xff] (!%p471_p2)  ;;  %v201_v2 = vld [vmem:[%s192_s16 + $0x10] sm:$0xff] (!%p471_p2)  ;;  %v568_v19 = vpack.c.bf16 (!%p471_p2), %v284_v17, %v283_v16 }
  0x2a   : > { %v553_v4 = vpack.c.bf16 (!%p471_p2), %v200_v1, %v199_v0  ;;  %v202_v5 = vld [vmem:[%s192_s16 + $0x18] sm:$0xff] (!%p471_p2)  ;;  %v203_v13 = vld [vmem:[%s192_s16 + $0x20] sm:$0xff] (!%p471_p2)  ;;  %v204_v14 = vld [vmem:[%s192_s16 + $0x28] sm:$0xff] (!%p471_p2)  ;;  %563 = vmatpush3.bf16.msra.mxu1 (!%p471_p2), %v562_v10 }
  0x2b   : > { %v556_v9 = vpack.c.bf16 (!%p471_p2), %v202_v5, %v201_v2  ;;  %564 = vmatprep.subr.bf16.mxu1 (!%p471_p2), %v708_v3  ;;  %v559_v18 = vpack.c.bf16 (!%p471_p2), %v204_v14, %v203_v13  ;;  %v286_v21 = vld [vmem:[%s907_s3 + $0x38] sm:$0xff] (!%p471_p2)  ;;  %v198_v22 = vld [vmem:[%s799_s13] sm:$0xff] (!%p471_p2)  ;;  %v288_v25 = vld [vmem:[%s907_s3 + $0x48] sm:$0xff] (!%p471_p2) }
  0x2c   : > { %554 = vmatpush3.bf16.msra.mxu0 (!%p471_p2), %v553_v4  ;;  %v571_v23 = vpack.c.bf16 (!%p471_p2), %v286_v21, %v285_v20  ;;  %v287_v24 = vld [vmem:[%s907_s3 + $0x40] sm:$0xff] (!%p471_p2)  ;;  %v289_v27 = vld [vmem:[%s907_s3 + $0x50] sm:$0xff] (!%p471_p2)  ;;  %v290_v28 = vld [vmem:[%s907_s3 + $0x58] sm:$0xff] (!%p471_p2) }
  0x2d   : > { %555 = vmatprep.subr.bf16.mxu0 (!%p471_p2), %v708_v3  ;;  %v574_v26 = vpack.c.bf16 (!%p471_p2), %v288_v25, %v287_v24  ;;  %v577_v29 = vpack.c.bf16 (!%p471_p2), %v290_v28, %v289_v27  ;;  %v291_v30 = vld [vmem:[%s907_s3 + $0x60] sm:$0xff] (!%p471_p2)  ;;  %v292_v31 = vld [vmem:[%s907_s3 + $0x68] sm:$0xff] (!%p471_p2)  ;;  %v293_v33 = vld [vmem:[%s907_s3 + $0x70] sm:$0xff] (!%p471_p2) }
  0x2e   : > { %566 = vmatpush3.bf16.msra.mxu1 %v565_v15  ;;  %v580_v32 = vpack.c.bf16 %v292_v31, %v291_v30  ;;  %v294_v34 = vld [vmem:[%s907_s3 + $0x78] sm:$0xff] }
  0x2f   : > { %567 = vmatprep.subr.bf16.mxu1 %v708_v3  ;;  %v583_v35 = vpack.c.bf16 %v294_v34, %v293_v33 }
  0x30   : > { %557 = vmatpush3.bf16.msra.mxu0 %v556_v9 }
  0x31   : > { %558 = vmatprep.subr.bf16.mxu0 %v708_v3 }
  0x32   : > { %569 = vmatpush3.bf16.msra.mxu1 %v568_v19 }
  0x33   : > { %570 = vmatprep.subr.bf16.mxu1 %v708_v3 }
  0x34   : > { %560 = vmatpush3.bf16.msra.mxu0 %v559_v18 }
  0x36   : > { %572 = vmatpush3.bf16.msra.mxu1 %v571_v23 }
  0x37   : > { %515 = vmatmul.mubr.msk.f32.vlgmr.msra.gmra.mrb[0].mxu0 %vm205_vm1, %v198_v22  ;;  %573 = vmatprep.subr.bf16.mxu1 %v708_v3 }
  0x3a   : > { %575 = vmatpush3.bf16.msra.mxu1 %v574_v26 }
  0x3b   : > { %576 = vmatprep.subr.bf16.mxu1 %v708_v3 }
  0x3e   : > { %578 = vmatpush3.bf16.msra.mxu1 %v577_v29 }
  0x3f   : > { %579 = vmatprep.subr.bf16.mxu1 %v708_v3 }
  0x42   : > { %581 = vmatpush3.bf16.msra.mxu1 %v580_v32 }
  0x43   : > { %582 = vmatprep.subr.bf16.mxu1 %v708_v3 }
  0x46   : > { %584 = vmatpush3.bf16.msra.mxu1 %v583_v35 }
 0x10a   : > { %v275_v36 = vpop.f32.mrb[0].mxu0 }
 0x10b   : > { %v516_v37 = vpop.f32.mrb[1].mxu0  ;;  %550 = vmatmul.mubr.f32.vlgmr.msra.gmra.mrb[0].mxu1 %v275_v36 }
 0x1de   : > { %v361_v38 = vpop.f32.mrb[0].mxu1 }
 0x1df   : > { %366 = vst.msk [vmem:[%s804_s17] sm:$0xff] %vm365_vm2, %v361_v38  ;;  %v551_v39 = vpop.f32.mrb[1].mxu1 }
 0x1e0 PF: > { %p473_p3 = scmp.ge.s32.totalorder %s793_s7, 32 }
 0x1e1   : > { %v372_v40 = vlaneseq (!%p473_p3)  ;;  %v374_v41 = vstv (!%p473_p3), %s793_s7  ;;  %v371_v42 = vld [vmem:[%s799_s13] sm:$0xff] (!%p473_p3)  ;;  %vm377_vm3 = vcmask (!%p473_p3), 261120  }
 0x1e2   : > { %370 = sbr.rel (%p473_p3) target bundleno = 489 (0x1e9), region = 40 }
 0x1e3   : > { %v373_v43 = vand.u32 (!%p473_p3), 127, %v372_v40 }
 0x1e5   : > { %vm375_vm4 = vcmp.lt.s32.totalorder (!%p473_p3), %v373_v43, %v374_v41 }
 0x1e6   : > { %v376_v44 = vsel (!%p473_p3), %vm375_vm4, %v371_v42, 0.0 }
 0x1e7   : > { %378 = vst.msk [vmem:[%s804_s17] sm:$0xff] (!%p473_p3), %vm377_vm3, %v376_v44 }
 0x1e9 PF: > { %s475_s27 = sshll.u32 %s761_s23, 7  ;;  %s393_s10 = sshll.u32 %s804_s17, 4  ;;  %s394_s10 = int_to_ptr.vmem [resolvable:$true] %s393_s10 }
 0x1ea   : > { %s865_s9 = scalar_lea.hbm %s908_s4, %s475_s27  ;;  %s380_s7 = scalar_lea.sflag [#allocation5], %s181_s5 }
 0x1eb   : > { %s641_s13 = scalar_lea.vmem %s394_s10, 128  ;;  %s711_s11 = smov [#allocation4]  }
 0x1ec   : > { %p642_p4 = scmp.ne.s32.totalorder %s394_s10, %s641_s13  ;;  %s645_s12 = sshll.u32 %s711_s11, 4  ;;  %s646_s12 = int_to_ptr.vmem [resolvable:$false] %s645_s12 }
 0x1ed   : > { %s647_s14 = scalar_lea.vmem %s646_s12, 256  ;;  %p648_p7 = scmp.lt.s32.totalorder %s394_s10, %s646_s12 }
 0x1ee   : > { %p643_p5 = pnand %p642_p4, %p778_p10  ;;  %p649_p8 = scmp.lt.s32.totalorder %s647_s14, %s641_s13 }
 0x1f0   : > { %p644_p6 = pneg %p643_p5  ;;  %p650_p9 = por %p649_p8, %p648_p7 }
 0x1f2   : > { %p651_p12 = pnand %p650_p9, %p644_p6 }
 0x1f4   : > { %654 = shalt.err (!%p651_p12)
}
 0x1f5   : > { %s655_s23 = scalar_lea.hbm %s865_s9, 128  ;;  %s659_s15 = scalar_lea.hbm %s908_s4, 256 }
 0x1f6   : > { %p656_p13 = scmp.ne.s32.totalorder %s865_s9, %s655_s23  ;;  %p660_p2 = scmp.lt.u32.totalorder %s865_s9, %s908_s4 }
 0x1f7   : > { %p661_p3 = scmp.lt.u32.totalorder %s659_s15, %s655_s23  ;;  %p663_p5 = scmp.lt.u32.totalorder %s655_s23, %s865_s9 }
 0x1f8   : > { %p657_p0 = pnand %p656_p13, %p778_p10 }
 0x1f9   : > { %p662_p4 = por %p661_p3, %p660_p2 }
 0x1fa   : > { %p658_p1 = pneg %p657_p0 }
 0x1fb   : > { %p664_p6 = por %p663_p5, %p662_p4 }
 0x1fd   : > { %p665_p7 = pnand %p664_p6, %p658_p1 }
 0x1ff   : > { %668 = shalt.err (!%p665_p7)
}
 0x200   : > { %586 = dma.vmem_to_hbm [thread:$0]  (%p778_p10), %s394_s10, 128, %s865_s9, %s380_s7  }
 0x201 PF: > { %p592_p8 = scmp.ge.s32.totalorder %s705_s22, 2  ;;  %s405_s19 = sand.u32 1, %s693_s20  }
 0x202   : > { %s406_s24 = scalar_lea.sflag [#allocation5], %s405_s19 }
 0x203   : > { %p589_p9 = pnand %p592_p8, %p782_p11 }
 0x205   : > { %688 = dma.done.wait (!%p589_p9), %s406_s24, 128  }
 0x206   : > { %690 = vsyncadd (!%p589_p9), %s406_s24, 4294967168  ;;  %p20_p12 = scmp.ge.s32.totalorder %s765_s25, 4   ;;  %s911_s20 = smov %s697_s21 }
 0x207   : > { %s912_s21 = smov %s701_s0  ;;  %s913_s0 = smov %s776_s28 }
 0x208   : > { %s914_s22 = smov %s765_s25  ;;  %22 = sbr.rel (!%p20_p12) target bundleno = 18 (0x12), region = 78 }
 0x20f   :  { %411 = vsyncpa [#allocation5], 1 }
 0x210   :  { %413 = vsyncpa [#allocation5 + $0x1], 1 }

</bundles_post_ra>
